<compile_context>
chip_gen: v6e
topology: v6e:2x2x1
jax: 0.10.0
libtpu: 0.0.40
codegen_flags: <defaults>
</compile_context>

<pallas_src>
import functools

import jax
import jax.numpy as jnp
from jax.experimental import pallas as pl
from jax.experimental.pallas import tpu as pltpu

_LANE = 128


def _cdiv(a, m):
    return (a + m - 1) // m


def _round_up(a, m):
    return _cdiv(a, m) * m


def _sigmoid(x):
    # EUP-friendly sigmoid: tanh uses the (otherwise idle) EUP slot, no VPU divide.
    return 0.5 * jnp.tanh(0.5 * x) + 0.5


def _supports_bf16_epilogue():
    """bf16 VPU/EUP exists on v6e / v7x; v5e and older stay f32 (fast path there)."""
    try:
        kind = jax.devices()[0].device_kind.lower()
    except Exception:
        return False
    return not any(tag in kind for tag in ("v2", "v3", "v4", "v5"))


def red_kernel(x_ref, w1_ref, b1_ref, w2_ref, b2_ref, w3_ref, b3_ref, o_ref,
               *, bf16_epilogue):
    # x_ref: [n_in, TB] bf16 (batch lives in the lane dim)
    # w1_ref: [d1, n_in] bf16 ; b1_ref: [d1, 1]
    # w2_ref: [d2, d1]        ; b2_ref: [d2, 1] f32
    # w3_ref: [d2, 1] f32     ; b3_ref: [1, 1] f32
    # o_ref : [1, 1, TB] f32  (lane-dense output row)

    # Layer 1 on the MXU, f32 accumulation: [d1, n_in] @ [n_in, TB] -> [d1, TB].
    z1 = jnp.dot(w1_ref[...], x_ref[...], preferred_element_type=jnp.float32)
    if bf16_epilogue:
        z1 = z1.astype(jnp.bfloat16)          # bf16 bias+sigmoid on v6e/v7x EUP/VPU
    h1 = _sigmoid(z1 + b1_ref[...])           # [d1, TB]

    # Layer 2 on the MXU: [d2, d1] @ [d1, TB] -> [d2, TB] (dense vreg tiles).
    z2 = jnp.dot(w2_ref[...], h1, preferred_element_type=jnp.float32)
    h2 = _sigmoid(z2 + b2_ref[...])           # [d2, TB] f32

    # Layer 3 as a sublane (XLU) weighted reduce instead of an [d2 x 1] MXU matmul.
    z3 = jnp.sum(h2 * w3_ref[...], axis=0, keepdims=True) + b3_ref[...]   # [1, TB]
    o_ref[...] = _sigmoid(z3)[None].astype(o_ref.dtype)                   # [1, 1, TB]


def _choose_tile(batch, n_in, d1, d2, bf16_epilogue, max_tb, budget_bytes):
    """Pick the batch tile from a VMEM budget; >= 2 tiles when batch allows it."""
    per_row = (2 * n_in * 2                              # double-buffered bf16 x column
               + d1 * 4                                  # f32 layer-1 accumulator
               + d1 * (2 if bf16_epilogue else 4)        # h1 epilogue copy
               + d2 * 4 * 2                              # z2 / h2
               + 2 * 4)                                  # double-buffered f32 out row
    tb_cap = max(_LANE, min(max_tb, (budget_bytes // per_row) // _LANE * _LANE))
    b_ceil = _round_up(batch, _LANE)
    # v7x megacore: aim for >= 2 tiles whenever the batch spans >= 2 lane groups.
    min_tiles = 2 if b_ceil >= 2 * _LANE else 1
    num_tiles = max(min_tiles, _cdiv(b_ceil, tb_cap))
    tb = _round_up(_cdiv(b_ceil, num_tiles), _LANE)      # tail-aware: tb ~ B/num_tiles
    num_tiles = _cdiv(b_ceil, tb)
    return tb, num_tiles


@functools.partial(jax.jit, static_argnames=("max_tb",))
def red_forward(x, params, *, max_tb=4096):
    """Fused forward pass of Red.  x: [B, n_in] float32.  params in PyTorch layout."""
    w1, b1, w2, b2, w3, b3 = params            # w: [out, in], b: [out]
    B, n_in = x.shape
    d1 = w1.shape[0]
    d2 = w2.shape[0]

    bf16_epi = _supports_bf16_epilogue()

    # Budget of 8 MiB keeps us well inside the smallest scoped-VMEM default
    # (v5e: 16 MiB) even with double-buffering and the resident weights.
    tb, num_tiles = _choose_tile(B, n_in, d1, d2, bf16_epi,
                                 max_tb=max_tb, budget_bytes=8 << 20)
    b_pad = tb * num_tiles

    # bf16 for the dominant HBM traffic (x) and W1; transpose so the batch is
    # the lane dim everywhere (lane-dense intermediates and output stores).
    x_t = x.astype(jnp.bfloat16).T                       # [n_in, B]
    if b_pad != B:
        x_t = jnp.pad(x_t, ((0, 0), (0, b_pad - B)))

    w1_bf = w1.astype(jnp.bfloat16)                      # [d1, n_in]
    b1_col = b1.reshape(d1, 1)
    b2_col = b2.reshape(d2, 1).astype(jnp.float32)
    w3_col = w3.reshape(d2, 1).astype(jnp.float32)
    b3_sc = b3.reshape(1, 1).astype(jnp.float32)
    if bf16_epi:
        b1_col = b1_col.astype(jnp.bfloat16)
        w2_arr = w2.astype(jnp.bfloat16)
    else:
        b1_col = b1_col.astype(jnp.float32)
        w2_arr = w2.astype(jnp.float32)

    # Weights/biases: constant index_map -> VMEM-resident across grid steps.
    def resident(a):
        return pl.BlockSpec(a.shape, lambda i, _nd=a.ndim: (0,) * _nd)

    def nbytes(a):
        return a.size * a.dtype.itemsize

    resident_bytes = int(sum(nbytes(a) for a in
                             (w1_bf, b1_col, w2_arr, b2_col, w3_col, b3_sc)))
    live_bytes = tb * (d1 * 4 + d1 * (2 if bf16_epi else 4) + d2 * 4 * 2 + 4 * 2)
    vmem_needed = 2 * (n_in * tb * 2 + tb * 4) + resident_bytes + live_bytes
    # Explicit limit with headroom; 32 MiB is safe on every generation
    # (v5e/v6e 128 MiB physical, v7x 64 MiB physical).
    vmem_limit = int(min(max(2 * vmem_needed, 16 * 1024 * 1024), 32 * 1024 * 1024))

    flops = 2 * b_pad * (n_in * d1 + d1 * d2 + d2)
    transcendentals = b_pad * (d1 + d2 + 1)
    bytes_accessed = n_in * b_pad * 2 + resident_bytes + b_pad * 4

    out = pl.pallas_call(
        functools.partial(red_kernel, bf16_epilogue=bf16_epi),
        out_shape=jax.ShapeDtypeStruct((num_tiles, 1, tb), jnp.float32),
        grid=(num_tiles,),
        in_specs=[
            pl.BlockSpec((n_in, tb), lambda i: (0, i)),   # x^T streamed over batch
            resident(w1_bf), resident(b1_col),
            resident(w2_arr), resident(b2_col),
            resident(w3_col), resident(b3_sc),
        ],
        out_specs=pl.BlockSpec((1, 1, tb), lambda i: (i, 0, 0)),
        compiler_params=pltpu.CompilerParams(
            dimension_semantics=("parallel",),            # megacore split on v7x
            vmem_limit_bytes=vmem_limit),
        cost_estimate=pl.CostEstimate(
            flops=int(flops), transcendentals=int(transcendentals),
            bytes_accessed=int(bytes_accessed)),
    )(x_t, w1_bf, b1_col, w2_arr, b2_col, w3_col, b3_sc)

    return out.reshape(b_pad, 1)[:B]


def init_params(key, n_entradas):
    """Deterministic init mimicking nn.Linear default (uniform +/- 1/sqrt(fan_in)).
    PyTorch layout: weight [out, in], bias [out]."""
    def linear(k, fan_in, fan_out):
        kw, kb = jax.random.split(k)
        bound = 1.0 / jnp.sqrt(jnp.float32(fan_in))
        w = jax.random.uniform(kw, (fan_out, fan_in), jnp.float32, -bound, bound)
        b = jax.random.uniform(kb, (fan_out,), jnp.float32, -bound, bound)
        return w, b

    k1, k2, k3 = jax.random.split(key, 3)
    w1, b1 = linear(k1, n_entradas, 128)
    w2, b2 = linear(k2, 128, 8)
    w3, b3 = linear(k3, 8, 1)
    return (w1, b1, w2, b2, w3, b3)


def red_reference_f32(x, params):
    """Pure-JAX f32 reference (matches the PyTorch module semantics)."""
    w1, b1, w2, b2, w3, b3 = params
    h = jax.nn.sigmoid(x @ w1.T + b1)
    h = jax.nn.sigmoid(h @ w2.T + b2)
    return jax.nn.sigmoid(h @ w3.T + b3)


def red_reference_kernel_numerics(x, params, bf16_epilogue):
    """Reference mirroring the kernel's numerics (bf16 x/W1, optional bf16 epilogue)."""
    w1, b1, w2, b2, w3, b3 = params
    z1 = jnp.dot(x.astype(jnp.bfloat16), w1.T.astype(jnp.bfloat16),
                 preferred_element_type=jnp.float32)
    if bf16_epilogue:
        h1 = _sigmoid(z1.astype(jnp.bfloat16) + b1.astype(jnp.bfloat16))
        z2 = jnp.dot(h1, w2.T.astype(jnp.bfloat16),
                     preferred_element_type=jnp.float32)
    else:
        h1 = _sigmoid(z1 + b1)
        z2 = jnp.dot(h1, w2.T, preferred_element_type=jnp.float32)
    h2 = _sigmoid(z2 + b2)
    z3 = jnp.dot(h2, w3.T, preferred_element_type=jnp.float32) + b3
    return _sigmoid(z3)


if __name__ == "__main__":
    key = jax.random.PRNGKey(0)
    k_param, k_x1, k_x2 = jax.random.split(key, 3)

    n_entradas = 32
    params = init_params(k_param, n_entradas)
    bf16_epi = _supports_bf16_epilogue()

    # Small case (single tile).
    batch = 16
    x = jax.random.normal(k_x1, (batch, n_entradas), jnp.float32)
    out = jax.block_until_ready(red_forward(x, params))
    assert out.shape == (batch, 1)
    assert jnp.allclose(out, red_reference_kernel_numerics(x, params, bf16_epi),
                        atol=3e-3, rtol=3e-3)
    assert jnp.allclose(out, red_reference_f32(x, params), atol=2e-2, rtol=2e-2)

    # Larger case exercising the multi-tile + tail-padding path.
    batch2 = 300
    x2 = jax.random.normal(k_x2, (batch2, n_entradas), jnp.float32)
    out2 = jax.block_until_ready(red_forward(x2, params))
    assert out2.shape == (batch2, 1)
    assert jnp.allclose(out2, red_reference_kernel_numerics(x2, params, bf16_epi),
                        atol=3e-3, rtol=3e-3)
    assert jnp.allclose(out2, red_reference_f32(x2, params), atol=2e-2, rtol=2e-2)

    print("KERNEL_OK")
</pallas_src>

<mosaic_0001>
module attributes {stable_mosaic.version = 11 : i64} {
  func.func @red_kernel(%arg0: i32, %arg1: memref<32x128xbf16, #tpu.memory_space<vmem>>, %arg2: memref<128x32xbf16, #tpu.memory_space<vmem>>, %arg3: memref<128x1xbf16, #tpu.memory_space<vmem>>, %arg4: memref<8x128xbf16, #tpu.memory_space<vmem>>, %arg5: memref<8x1xf32, #tpu.memory_space<vmem>>, %arg6: memref<8x1xf32, #tpu.memory_space<vmem>>, %arg7: memref<1x1xf32, #tpu.memory_space<vmem>>, %arg8: memref<1x1x128xf32, #tpu.memory_space<vmem>>) attributes {dimension_semantics = [#tpu.dimension_semantics<parallel>], iteration_bounds = array<i64: 1>, scalar_prefetch = 0 : i64, scratch_operands = 0 : i64, tpu.core_type = #tpu.core_type<tc>, window_params = [{transform_indices = @transform_0, window_bounds = array<i64: 32, 128>}, {pipeline_mode = #tpu.pipeline_mode<synchronous>, transform_indices = @transform_1, window_bounds = array<i64: 128, 32>}, {pipeline_mode = #tpu.pipeline_mode<synchronous>, transform_indices = @transform_2, window_bounds = array<i64: 128, 1>}, {pipeline_mode = #tpu.pipeline_mode<synchronous>, transform_indices = @transform_3, window_bounds = array<i64: 8, 128>}, {pipeline_mode = #tpu.pipeline_mode<synchronous>, transform_indices = @transform_4, window_bounds = array<i64: 8, 1>}, {pipeline_mode = #tpu.pipeline_mode<synchronous>, transform_indices = @transform_5, window_bounds = array<i64: 8, 1>}, {pipeline_mode = #tpu.pipeline_mode<synchronous>, transform_indices = @transform_6, window_bounds = array<i64: 1, 1>}, {transform_indices = @transform_7, window_bounds = array<i64: 1, 1, 128>}]} {
    %c0 = arith.constant 0 : index
    %c0_0 = arith.constant 0 : index
    %0 = vector.load %arg2[%c0, %c0_0] : memref<128x32xbf16, #tpu.memory_space<vmem>>, vector<128x32xbf16>
    %c0_1 = arith.constant 0 : index
    %c0_2 = arith.constant 0 : index
    %1 = vector.load %arg1[%c0_1, %c0_2] : memref<32x128xbf16, #tpu.memory_space<vmem>>, vector<32x128xbf16>
    %cst = arith.constant dense<0.000000e+00> : vector<128x128xf32>
    %2 = tpu.matmul %0, %1, %cst {dimension_numbers = #tpu.dot_dimension_numbers<[1], [0], [0], [1], [0, 0, 1, 1], [], []>} : vector<128x32xbf16>, vector<32x128xbf16>, vector<128x128xf32> -> vector<128x128xf32>
    %3 = arith.truncf %2 : vector<128x128xf32> to vector<128x128xbf16>
    %c0_3 = arith.constant 0 : index
    %c0_4 = arith.constant 0 : index
    %4 = vector.load %arg3[%c0_3, %c0_4] : memref<128x1xbf16, #tpu.memory_space<vmem>>, vector<128x1xbf16>
    %5 = vector.broadcast %4 : vector<128x1xbf16> to vector<128x128xbf16>
    %6 = arith.addf %3, %5 : vector<128x128xbf16>
    %cst_5 = arith.constant 5.000000e-01 : bf16
    %7 = vector.broadcast %cst_5 : bf16 to vector<128x128xbf16>
    %8 = arith.mulf %7, %6 : vector<128x128xbf16>
    %9 = math.tanh %8 : vector<128x128xbf16>
    %cst_6 = arith.constant 5.000000e-01 : bf16
    %10 = vector.broadcast %cst_6 : bf16 to vector<128x128xbf16>
    %11 = arith.mulf %10, %9 : vector<128x128xbf16>
    %cst_7 = arith.constant 5.000000e-01 : bf16
    %12 = vector.broadcast %cst_7 : bf16 to vector<128x128xbf16>
    %13 = arith.addf %11, %12 : vector<128x128xbf16>
    %c0_8 = arith.constant 0 : index
    %c0_9 = arith.constant 0 : index
    %14 = vector.load %arg4[%c0_8, %c0_9] : memref<8x128xbf16, #tpu.memory_space<vmem>>, vector<8x128xbf16>
    %cst_10 = arith.constant dense<0.000000e+00> : vector<8x128xf32>
    %15 = tpu.matmul %14, %13, %cst_10 {dimension_numbers = #tpu.dot_dimension_numbers<[1], [0], [0], [1], [0, 0, 1, 1], [], []>} : vector<8x128xbf16>, vector<128x128xbf16>, vector<8x128xf32> -> vector<8x128xf32>
    %c0_11 = arith.constant 0 : index
    %c0_12 = arith.constant 0 : index
    %16 = vector.load %arg5[%c0_11, %c0_12] : memref<8x1xf32, #tpu.memory_space<vmem>>, vector<8x1xf32>
    %17 = vector.broadcast %16 : vector<8x1xf32> to vector<8x128xf32>
    %18 = arith.addf %15, %17 : vector<8x128xf32>
    %cst_13 = arith.constant 5.000000e-01 : f32
    %19 = vector.broadcast %cst_13 : f32 to vector<8x128xf32>
    %20 = arith.mulf %19, %18 : vector<8x128xf32>
    %21 = math.tanh %20 : vector<8x128xf32>
    %cst_14 = arith.constant 5.000000e-01 : f32
    %22 = vector.broadcast %cst_14 : f32 to vector<8x128xf32>
    %23 = arith.mulf %22, %21 : vector<8x128xf32>
    %cst_15 = arith.constant 5.000000e-01 : f32
    %24 = vector.broadcast %cst_15 : f32 to vector<8x128xf32>
    %25 = arith.addf %23, %24 : vector<8x128xf32>
    %c0_16 = arith.constant 0 : index
    %c0_17 = arith.constant 0 : index
    %26 = vector.load %arg6[%c0_16, %c0_17] : memref<8x1xf32, #tpu.memory_space<vmem>>, vector<8x1xf32>
    %27 = vector.broadcast %26 : vector<8x1xf32> to vector<8x128xf32>
    %28 = arith.mulf %25, %27 : vector<8x128xf32>
    %cst_18 = arith.constant dense<0.000000e+00> : vector<128xf32>
    %29 = vector.multi_reduction <add>, %28, %cst_18 [0] : vector<8x128xf32> to vector<128xf32>
    %30 = vector.shape_cast %29 : vector<128xf32> to vector<1x128xf32>
    %c0_19 = arith.constant 0 : index
    %c0_20 = arith.constant 0 : index
    %31 = vector.load %arg7[%c0_19, %c0_20] : memref<1x1xf32, #tpu.memory_space<vmem>>, vector<1x1xf32>
    %32 = vector.broadcast %31 : vector<1x1xf32> to vector<1x128xf32>
    %33 = arith.addf %30, %32 : vector<1x128xf32>
    %cst_21 = arith.constant 5.000000e-01 : f32
    %34 = vector.broadcast %cst_21 : f32 to vector<1x128xf32>
    %35 = arith.mulf %34, %33 : vector<1x128xf32>
    %36 = math.tanh %35 : vector<1x128xf32>
    %cst_22 = arith.constant 5.000000e-01 : f32
    %37 = vector.broadcast %cst_22 : f32 to vector<1x128xf32>
    %38 = arith.mulf %37, %36 : vector<1x128xf32>
    %cst_23 = arith.constant 5.000000e-01 : f32
    %39 = vector.broadcast %cst_23 : f32 to vector<1x128xf32>
    %40 = arith.addf %38, %39 : vector<1x128xf32>
    %41 = vector.shape_cast %40 : vector<1x128xf32> to vector<1x1x128xf32>
    %c0_24 = arith.constant 0 : index
    %c0_25 = arith.constant 0 : index
    %c0_26 = arith.constant 0 : index
    %42 = vector.load %arg8[%c0_24, %c0_25, %c0_26] : memref<1x1x128xf32, #tpu.memory_space<vmem>>, vector<1x1x128xf32>
    tpu.vector_store %arg8[%c0_24, %c0_25, %c0_26], %41 {strides = array<i32>} : memref<1x1x128xf32, #tpu.memory_space<vmem>>, vector<1x1x128xf32>,
    return
  }
  func.func @transform_0(%arg0: i32) -> (i32, i32) {
    %c0_i32 = arith.constant 0 : i32
    %c0_i32_0 = arith.constant 0 : i32
    return %c0_i32, %arg0 : i32, i32
  }
  func.func @transform_1(%arg0: i32) -> (i32, i32) {
    %c0_i32 = arith.constant 0 : i32
    %c0_i32_0 = arith.constant 0 : i32
    %c0_i32_1 = arith.constant 0 : i32
    return %c0_i32, %c0_i32_0 : i32, i32
  }
  func.func @transform_2(%arg0: i32) -> (i32, i32) {
    %c0_i32 = arith.constant 0 : i32
    %c0_i32_0 = arith.constant 0 : i32
    %c0_i32_1 = arith.constant 0 : i32
    return %c0_i32, %c0_i32_0 : i32, i32
  }
  func.func @transform_3(%arg0: i32) -> (i32, i32) {
    %c0_i32 = arith.constant 0 : i32
    %c0_i32_0 = arith.constant 0 : i32
    %c0_i32_1 = arith.constant 0 : i32
    return %c0_i32, %c0_i32_0 : i32, i32
  }
  func.func @transform_4(%arg0: i32) -> (i32, i32) {
    %c0_i32 = arith.constant 0 : i32
    %c0_i32_0 = arith.constant 0 : i32
    %c0_i32_1 = arith.constant 0 : i32
    return %c0_i32, %c0_i32_0 : i32, i32
  }
  func.func @transform_5(%arg0: i32) -> (i32, i32) {
    %c0_i32 = arith.constant 0 : i32
    %c0_i32_0 = arith.constant 0 : i32
    %c0_i32_1 = arith.constant 0 : i32
    return %c0_i32, %c0_i32_0 : i32, i32
  }
  func.func @transform_6(%arg0: i32) -> (i32, i32) {
    %c0_i32 = arith.constant 0 : i32
    %c0_i32_0 = arith.constant 0 : i32
    %c0_i32_1 = arith.constant 0 : i32
    return %c0_i32, %c0_i32_0 : i32, i32
  }
  func.func @transform_7(%arg0: i32) -> (i32, i32, i32) {
    %c0_i32 = arith.constant 0 : i32
    %c0_i32_0 = arith.constant 0 : i32
    %c0_i32_1 = arith.constant 0 : i32
    return %arg0, %c0_i32, %c0_i32_0 : i32, i32, i32
  }
}

</mosaic_0001>

<bundles_post_ra>
// kernel: red_forward.1
= control target key start
LH: loop header
LB: loop body
LE: loop exit
PB: predicated region body
PF: predicated region fallthrough
CT: control target
= control target key end

     0   :  { %v733_v1 = vmov 0   ;;  %vm102_vm0 = vcmask 261120   ;;  %v734_v31 = vmov 0.0   ;;  %vm735_vm1 = vmmov 0   ;;  %s912_s0 = inlined_call_operand.vmem [shape: bf16[32,128], index: 0, kind: input, shape index: {}]   ;;  %s913_s1 = inlined_call_operand.vmem [shape: bf16[128,32], index: 1, kind: input, shape index: {}]   ;;  %s914_s6 = inlined_call_operand.<no memory space> [shape: f32[1,1], index: 6, kind: input, shape index: {}]   ;;  %s915_s2 = inlined_call_operand.vmem [shape: bf16[128,1], index: 2, kind: input, shape index: {}]   ;;  %s916_s4 = inlined_call_operand.vmem [shape: f32[8,1], index: 4, kind: input, shape index: {}]   ;;  %s917_s5 = inlined_call_operand.vmem [shape: f32[8,1], index: 5, kind: input, shape index: {}]   ;;  %s918_s3 = inlined_call_operand.vmem [shape: bf16[8,128], index: 3, kind: input, shape index: {}]   ;;  %s919_s7 = inlined_call_operand.vmem [shape: f32[1,1,128], index: 7, kind: output, shape index: {}]  }
   0x1   :  { %v703_v0 = vld [vmem:[%s912_s0 + $0x8] sm:$0xff]   ;;  %702 = vset.pattern.permute.xlu1 %v733_v1  ;;  %701 = vset.pattern.permute.xlu0 %v733_v1  ;;  %v12_v2 = vstv %s914_s6  ;;  %v704_v3 = vld [vmem:[%s912_s0] sm:$0xff]   ;;  %v707_v6 = vld [vmem:[%s913_s1 + $0x10] sm:$0xff]   ;;  %v736_v45 = vmov 839922192   ;;  %v256_v47 = vlaneseq }
   0x2   :  { %13 = vst [vmem:[#allocation2] sm:$0x1] %v12_v2  ;;  %657 = vmatprep.subr.bf16.mxu0 %v703_v0  ;;  %v705_v4 = vld [vmem:[%s913_s1] sm:$0xff]   ;;  %v706_v5 = vld [vmem:[%s913_s1 + $0x8] sm:$0xff]   ;;  %v246_v7 = vld [vmem:[%s915_s2 + $0x38] sm:$0xf]  ;;  %677 = vmatprep.subr.bf16.mxu1 %v734_v31  ;;  %v254_v46 = vunpack.c.l.s4 %v736_v45 }
   0x3   :  { %658 = vmatpush3.bf16.msra.mxu0 %v703_v0  ;;  %661 = vmatprep.mubr.msk.bf16.mxu0 %vm102_vm0, %v705_v4  ;;  %v244_v8 = vld [vmem:[%s915_s2 + $0x30] sm:$0xf]  ;;  %v247_v9 = vld [vmem:[%s915_s2 + $0x3c] sm:$0xf]  ;;  %v245_v10 = vld [vmem:[%s915_s2 + $0x34] sm:$0xf] }
   0x4   :  { %659 = vmatprep.subr.bf16.mxu0 %v704_v3  ;;  %418 = vperm.xlu0 %701, %v246_v7   ;;  %v708_v11 = vld [vmem:[%s913_s1 + $0x18] sm:$0xff]   ;;  %v709_v12 = vld [vmem:[%s913_s1 + $0x20] sm:$0xff]   ;;  %v242_v13 = vld [vmem:[%s915_s2 + $0x28] sm:$0xf]  ;;  %v255_v52 = vunpack.c.0.s8 %v254_v46  ;;  %v888_v53 = vshrl.u32 %v256_v47, 7 }
   0x5   :  { %394 = vperm.xlu1 %702, %v244_v8   ;;  %v243_v14 = vld [vmem:[%s915_s2 + $0x2c] sm:$0xf]  ;;  %v240_v15 = vld [vmem:[%s915_s2 + $0x20] sm:$0xf]  ;;  %v241_v16 = vld [vmem:[%s915_s2 + $0x24] sm:$0xf]  ;;  %693 = vmatprep.mubr.msk.bf16.mxu1 %vm735_vm1, %v734_v31 }
   0x6   :  { %v710_v17 = vld [vmem:[%s913_s1 + $0x28] sm:$0xff]   ;;  %v711_v18 = vld [vmem:[%s913_s1 + $0x30] sm:$0xff]   ;;  %v238_v19 = vld [vmem:[%s915_s2 + $0x18] sm:$0xf]  ;;  %v258_v56 = vsub.s32 %v255_v52, %v888_v53 }
   0x7   :  { %660 = vmatpush3.bf16.msra.mxu0 %v704_v3  ;;  %v239_v20 = vld [vmem:[%s915_s2 + $0x1c] sm:$0xf]  ;;  %v236_v21 = vld [vmem:[%s915_s2 + $0x10] sm:$0xf]  ;;  %v237_v22 = vld [vmem:[%s915_s2 + $0x14] sm:$0xf] }
   0x8   :  { %430 = vperm.xlu0 %701, %v247_v9   ;;  %v712_v23 = vld [vmem:[%s913_s1 + $0x38] sm:$0xff]   ;;  %v234_v24 = vld [vmem:[%s915_s2 + $0x8] sm:$0xf]  ;;  %v235_v25 = vld [vmem:[%s915_s2 + $0xc] sm:$0xf] }
   0x9   :  { %406 = vperm.xlu1 %702, %v245_v10   ;;  %v232_v26 = vld [vmem:[%s915_s2] sm:$0xf]  ;;  %v233_v27 = vld [vmem:[%s915_s2 + $0x4] sm:$0xf] }
   0xa   :  { %662 = vmatmul.mubr.msk.bf16.vlgmr.msra.gmra.mxu0 %vm102_vm0, %v706_v5  ;;  %v529_v28 = vld [vmem:[%s916_s4] sm:$0xff] }
   0xb   :  { %665 = vmatprep.mubr.msk.bf16.mxu0 %vm102_vm0, %v707_v6  ;;  %v579_v29 = vld [vmem:[%s917_s5] sm:$0xff] }
   0xc   :  { %370 = vperm.xlu0 %701, %v242_v13   ;;  %v592_v30 = vld [vmem:[#allocation2] sm:$0x1] }
   0xd   :  { %382 = vperm.xlu1 %702, %v243_v14  }
  0x10   :  { %346 = vperm.xlu0 %701, %v240_v15  }
  0x11   :  { %358 = vperm.xlu1 %702, %v241_v16  }
  0x12   :  { %666 = vmatmul.mubr.msk.bf16.gmra.mxu0 %vm102_vm0, %v708_v11 }
  0x13   :  { %669 = vmatprep.mubr.msk.bf16.mxu0 %vm102_vm0, %v709_v12 }
  0x14   :  { %322 = vperm.xlu0 %701, %v238_v19  }
  0x15   :  { %334 = vperm.xlu1 %702, %v239_v20  }
  0x18   :  { %298 = vperm.xlu0 %701, %v236_v21  }
  0x19   :  { %310 = vperm.xlu1 %702, %v237_v22  }
  0x1a   :  { %670 = vmatmul.mubr.msk.bf16.gmra.mxu0 %vm102_vm0, %v710_v17 }
  0x1b   :  { %673 = vmatprep.mubr.msk.bf16.mxu0 %vm102_vm0, %v711_v18 }
  0x1c   :  { %274 = vperm.xlu0 %701, %v234_v24  }
  0x1d   :  { %286 = vperm.xlu1 %702, %v235_v25  }
  0x20   :  { %250 = vperm.xlu0 %701, %v232_v26  }
  0x21   :  { %262 = vperm.xlu1 %702, %v233_v27  }
  0x22   :  { %674 = vmatmul.mubr.msk.bf16.gmra.mxu0 %vm102_vm0, %v712_v23 }
  0x24   :  { %532 = vperm.xlu0 %701, %v529_v28  }
  0x25   :  { %582 = vperm.xlu1 %702, %v579_v29  }
  0x28   :  { %595 = vperm.xlu0 %701, %v592_v30  }
  0x7f   :  { %v419_v32 = vpop.permute.xlu0 %418 }
  0x80   :  { %v395_v33 = vpop.permute.xlu1 %394  ;;  %v427_v63 = vrot.slane %v419_v32, %v258_v56 }
  0x81   :  { %v403_v1 = vrot.slane %v395_v33, %v258_v56 }
  0x83   :  { %v431_v36 = vpop.permute.xlu0 %430 }
  0x84   :  { %v407_v37 = vpop.permute.xlu1 %406  ;;  %v439_v0 = vrot.slane %v431_v36, %v258_v56 }
  0x85   :  { %v415_v2 = vrot.slane %v407_v37, %v258_v56 }
  0x86   :  { %v637_v11 = vcombine.low %v427_v63, %v439_v0 }
  0x87   :  { %v371_v42 = vpop.permute.xlu0 %370  ;;  %v636_v13 = vcombine.low %v403_v1, %v415_v2 }
  0x88   :  { %v383_v41 = vpop.permute.xlu1 %382  ;;  %v379_v61 = vrot.slane %v371_v42, %v258_v56 }
  0x89   :  { %v391_v60 = vrot.slane %v383_v41, %v258_v56 }
  0x8b   :  { %v347_v50 = vpop.permute.xlu0 %346  ;;  %v635_v6 = vcombine.low %v379_v61, %v391_v60 }
  0x8c   :  { %v359_v49 = vpop.permute.xlu1 %358  ;;  %v355_v4 = vrot.slane %v347_v50, %v258_v56 }
  0x8d   :  { %v367_v3 = vrot.slane %v359_v49, %v258_v56 }
  0x8f   :  { %v323_v58 = vpop.permute.xlu0 %322  ;;  %v634_v14 = vcombine.low %v355_v4, %v367_v3 }
  0x90   :  { %v335_v57 = vpop.permute.xlu1 %334  ;;  %v331_v16 = vrot.slane %v323_v58, %v258_v56 }
  0x91   :  { %v343_v15 = vrot.slane %v335_v57, %v258_v56 }
  0x93   :  { %v299_v8 = vpop.permute.xlu0 %298  ;;  %v633_v26 = vcombine.low %v331_v16, %v343_v15  ;;  %v528_v16 = vld [vmem:[%s918_s3] sm:$0xf] }
  0x94   :  { %v311_v7 = vpop.permute.xlu1 %310  ;;  %v307_v28 = vrot.slane %v299_v8, %v258_v56 }
  0x95   :  { %v319_v27 = vrot.slane %v311_v7, %v258_v56 }
  0x97   :  { %v275_v23 = vpop.permute.xlu0 %274  ;;  %v632_v36 = vcombine.low %v307_v28, %v319_v27 }
  0x98   :  { %v287_v22 = vpop.permute.xlu1 %286  ;;  %v283_v41 = vrot.slane %v275_v23, %v258_v56 }
  0x99   :  { %v295_v37 = vrot.slane %v287_v22, %v258_v56 }
  0x9b   :  { %v251_v45 = vpop.permute.xlu0 %250  ;;  %v631_v50 = vcombine.low %v283_v41, %v295_v37 }
  0x9c   :  { %v263_v42 = vpop.permute.xlu1 %262  ;;  %v259_v52 = vrot.slane %v251_v45, %v258_v56 }
  0xa0   :  { %v583_v27 = vpop.permute.xlu1 %582 }
  0xca   :  { %v874_v34 = vpop.f32.mrf.mxu0 }
  0xcc   :  { %v876_v35 = vpop.f32.mrf.mxu0 }
  0xce   :  { %v878_v38 = vpop.f32.mrf.mxu0 }
  0xd0   :  { %v880_v39 = vpop.f32.mrf.mxu0 }
  0xd1   :  { %v224_v58 = vpack.c.bf16 %v880_v39, %v876_v35 }
  0xd2   :  { %v882_v40 = vpop.f32.mrf.mxu0 }
  0xd4   :  { %v884_v43 = vpop.f32.mrf.mxu0 }
  0xd6   :  { %v668_v44 = vpop.f32.mrf.mxu0 }
  0xd7   :  { %v227_v29 = vpack.c.bf16 %v668_v44, %v882_v40  ;;  %v225_v40 = vpack.c.bf16 %v878_v38, %v874_v34 }
  0xd8   :  { %v886_v48 = vpop.f32.mrf.mxu0 }
  0xd9   :  { %v491_v46 = vadd.bf16 %v633_v26, %v227_v29  ;;  %v226_v47 = vpack.c.bf16 %v886_v48, %v884_v43  ;;  %v489_v57 = vadd.bf16 %v631_v50, %v225_v40 }
  0xda   :  { %v671_v51 = vpop.f32.mrf.mxu0 }
  0xdb   :  { %v499_v44 = vmul.bf16 1056980736, %v491_v46  ;;  %v497_v61 = vmul.bf16 1056980736, %v489_v57 }
  0xdc   :  { %v193_v54 = vpop.f32.mrf.mxu0 }
  0xde   :  { %v672_v55 = vpop.f32.mrf.mxu0 }
  0xdf   :  { %v229_v9 = vpack.c.bf16 %v672_v55, %v671_v51  ;;  %v271_v51 = vrot.slane %v263_v42, %v258_v56 }
  0xe0   :  { %v196_v59 = vpop.f32.mrf.mxu0 }
  0xe1   :  { %v493_v18 = vadd.bf16 %v635_v6, %v229_v9  ;;  %v228_v19 = vpack.c.bf16 %v196_v59, %v193_v54  ;;  %v490_v54 = vadd.bf16 %v632_v36, %v226_v47  ;;  %v630_v55 = vcombine.low %v259_v52, %v271_v51 }
  0xe2   :  { %v675_v62 = vpop.f32.mrf.mxu0 }
  0xe3   :  { %v501_v30 = vmul.bf16 1056980736, %v493_v18  ;;  %v492_v32 = vadd.bf16 %v634_v14, %v228_v19  ;;  %v498_v59 = vmul.bf16 1056980736, %v490_v54 }
  0xe4   :  { %v209_v5 = vpop.f32.mrf.mxu0 }
  0xe5   :  { %v500_v49 = vmul.bf16 1056980736, %v492_v32  ;;  %v600_v32 = vsub.s32 0, %v888_v53 }
  0xe6   :  { %v676_v10 = vpop.f32.mrf.mxu0 }
  0xe7   :  { %v231_v12 = vpack.c.bf16 %v676_v10, %v675_v62  ;;  %v488_v62 = vadd.bf16 %v630_v55, %v224_v58 }
  0xe8   :  { %v212_v17 = vpop.f32.mrf.mxu0 }
  0xe9   :  { %v495_v20 = vadd.bf16 %v637_v11, %v231_v12  ;;  %v230_v21 = vpack.c.bf16 %v212_v17, %v209_v5  ;;  %v496_v34 = vmul.bf16 1056980736, %v488_v62  ;;  %v533_v17 = vpop.permute.xlu0 %532 }
  0xeb   :  { %v503_v24 = vmul.bf16 1056980736, %v495_v20  ;;  %v494_v25 = vadd.bf16 %v636_v13, %v230_v21 }
  0xed   :  { %713 = vtanh.bf16 %v503_v24  ;;  %v502_v33 = vmul.bf16 1056980736, %v494_v25  ;;  %v596_v36 = vpop.permute.xlu0 %595 }
  0xee   :  { %v601_v41 = vrot.slane %v596_v36, %v600_v32 }
  0xef   :  { %715 = vtanh.bf16 %v502_v33 }
  0xf0   :  { %717 = vtanh.bf16 %v501_v30 }
  0xf1   :  { %719 = vtanh.bf16 %v500_v49 }
  0xf2   :  { %721 = vtanh.bf16 %v499_v44 }
  0xf3   :  { %723 = vtanh.bf16 %v498_v59 }
  0xf4   :  { %725 = vtanh.bf16 %v497_v61 }
  0xf5   :  { %727 = vtanh.bf16 %v496_v34 }
  0xfb   :  { %v714_v60 = vpop.eup %713 }
  0xfc   :  { %v519_v43 = vmul.bf16 1056980736, %v714_v60 }
  0xfd   :  { %v716_v48 = vpop.eup %715 }
  0xfe   :  { %v527_v56 = vadd.bf16 1056980736, %v519_v43  ;;  %v518_v63 = vmul.bf16 1056980736, %v716_v48  ;;  %v718_v0 = vpop.eup %717 }
  0xff   :  { %v517_v1 = vmul.bf16 1056980736, %v718_v0  ;;  %v720_v2 = vpop.eup %719 }
 0x100   :  { %678 = vmatpush3.bf16.msra.mxu1 %v527_v56  ;;  %v526_v38 = vadd.bf16 1056980736, %v518_v63  ;;  %v516_v39 = vmul.bf16 1056980736, %v720_v2  ;;  %v722_v3 = vpop.eup %721 }
 0x101   :  { %679 = vmatprep.subr.bf16.mxu1 %v734_v31  ;;  %v525_v35 = vadd.bf16 1056980736, %v517_v1  ;;  %v515_v5 = vmul.bf16 1056980736, %v722_v3  ;;  %v724_v6 = vpop.eup %723 }
 0x102   :  { %v524_v4 = vadd.bf16 1056980736, %v516_v39  ;;  %v514_v8 = vmul.bf16 1056980736, %v724_v6  ;;  %v726_v9 = vpop.eup %725 }
 0x103   :  { %v523_v7 = vadd.bf16 1056980736, %v515_v5  ;;  %v513_v11 = vmul.bf16 1056980736, %v726_v9  ;;  %v728_v12 = vpop.eup %727 }
 0x104   :  { %680 = vmatpush3.bf16.msra.mxu1 %v526_v38  ;;  %v522_v10 = vadd.bf16 1056980736, %v514_v8  ;;  %v512_v14 = vmul.bf16 1056980736, %v728_v12 }
 0x105   :  { %681 = vmatprep.subr.bf16.mxu1 %v734_v31  ;;  %v521_v13 = vadd.bf16 1056980736, %v513_v11 }
 0x106   :  { %v520_v15 = vadd.bf16 1056980736, %v512_v14 }
 0x108   :  { %682 = vmatpush3.bf16.msra.mxu1 %v525_v35 }
 0x109   :  { %683 = vmatprep.subr.bf16.mxu1 %v734_v31 }
 0x10c   :  { %684 = vmatpush3.bf16.msra.mxu1 %v524_v4 }
 0x10d   :  { %685 = vmatprep.subr.bf16.mxu1 %v734_v31 }
 0x110   :  { %686 = vmatpush3.bf16.msra.mxu1 %v523_v7 }
 0x111   :  { %687 = vmatprep.subr.bf16.mxu1 %v734_v31 }
 0x114   :  { %688 = vmatpush3.bf16.msra.mxu1 %v522_v10 }
 0x115   :  { %689 = vmatprep.subr.bf16.mxu1 %v734_v31 }
 0x118   :  { %690 = vmatpush3.bf16.msra.mxu1 %v521_v13 }
 0x119   :  { %691 = vmatprep.subr.bf16.mxu1 %v734_v31 }
 0x11c   :  { %692 = vmatpush3.bf16.msra.mxu1 %v520_v15 }
 0x11f   :  { %694 = vmatmul.mubr.bf16.vlgmr.msra.gmra.mxu1 %v528_v16 }
 0x1df   :  { %v569_v18 = vpop.f32.mrf.mxu1 }
 0x1e0   :  { %v570_v19 = vadd.f32 %v569_v18, %v533_v17 }
 0x1e1   :  { %v695_v20 = vpop.f32.mrf.mxu1 }
 0x1e2   :  { %v575_v21 = vmul.f32 0.5, %v570_v19 }
 0x1e3   :  { %v572_v22 = vpop.f32.mrf.mxu1 }
 0x1e4   :  { %729 = vtanh.f32 %v575_v21 }
 0x1e5   :  { %v696_v23 = vpop.f32.mrf.mxu1 }
 0x1f1   :  { %v730_v24 = vpop.eup %729 }
 0x1f2   :  { %v577_v25 = vmul.f32 0.5, %v730_v24 }
 0x1f4   :  { %v578_v26 = vadd.f32 0.5, %v577_v25 }
 0x1f6   :  { %v585_v31 = vmul.f32 %v583_v27, %v578_v26 }
 0x1f8   :  { %v586_v28 = vrot.slane %v585_v31, 4 }
 0x1fa   :  { %v587_v29 = vadd.f32 %v586_v28, %v585_v31 }
 0x1fc   :  { %v588_v30 = vrot.slane %v587_v29, 2 }
 0x1fe   :  { %v589_v33 = vadd.f32 %v588_v30, %v587_v29 }
 0x200   :  { %v590_v37 = vrot.slane %v589_v33, 1 }
 0x202   :  { %v591_v42 = vadd.f32 %v590_v37, %v589_v33 }
 0x204   :  { %v602_v45 = vadd.f32 %v601_v41, %v591_v42 }
 0x206   :  { %v603_v46 = vmul.f32 0.5, %v602_v45 }
 0x208   :  { %731 = vtanh.f32 %v603_v46 }
 0x215   :  { %v732_v47 = vpop.eup %731 }
 0x216   :  { %v605_v49 = vmul.f32 0.5, %v732_v47 }
 0x218   :  { %v606_v50 = vadd.f32 0.5, %v605_v49 }
 0x21a   :  { %607 = vst [vmem:[%s919_s7] sm:$0x1] %v606_v50 }

</bundles_post_ra>
